<compile_context>
chip_gen: v7x
topology: tpu7x:2x2x1
jax: 0.10.0
libtpu: 0.0.40
codegen_flags: <defaults>
</compile_context>

<pallas_src>
import jax
import jax.numpy as jnp
from jax.experimental import pallas as pl
from jax.experimental.pallas import tpu as pltpu


def med_embedding_kernel(ids_ref, units_ref, dose_ref,
                         med_tab_ref, unit_tab_ref, embed_ref):
    # ids_ref/units_ref/dose_ref : (Bt, M*T, 1)   token order = m*T + t
    # med_tab_ref                : (Vm+1, E)  bf16
    # unit_tab_ref               : (Vu+1, Eu) bf16  (Eu == E or Eu == 1)
    # embed_ref                  : (Bt, T, E) f32
    Bt, TM, _ = ids_ref.shape
    T = embed_ref.shape[1]
    M = TM // T
    Vm, E = med_tab_ref.shape
    Vu, Eu = unit_tab_ref.shape
    N = Bt * TM

    # Flatten the batch block into one token axis so a single matmul feeds the
    # MXU (leading-dim merge only; last dim unchanged, TM % 8 == 0).
    ids = ids_ref[...].reshape(N, 1)      # (N, 1) int32
    uids = units_ref[...].reshape(N, 1)   # (N, 1) int32
    dose = dose_ref[...].reshape(N, 1)    # (N, 1) f32

    # Embedding lookup as one-hot @ table (MXU path, bf16 operands, f32 acc).
    iota_m = jax.lax.broadcasted_iota(jnp.int32, (N, Vm), 1)
    onehot_m = (ids == iota_m).astype(med_tab_ref.dtype)                 # (N, Vm)
    med_emb = jnp.dot(onehot_m, med_tab_ref[...],
                      preferred_element_type=jnp.float32)                # (N, E)

    iota_u = jax.lax.broadcasted_iota(jnp.int32, (N, Vu), 1)
    onehot_u = (uids == iota_u).astype(unit_tab_ref.dtype)               # (N, Vu)
    unit_emb = jnp.dot(onehot_u, unit_tab_ref[...],
                       preferred_element_type=jnp.float32)               # (N, Eu)

    # (units_emb * dose) * med_emb, grouped like the module.  When Eu == 1 the
    # first multiply is (N,1) and broadcasts over lanes in the second.
    combined = (unit_emb * dose) * med_emb                               # (N, E)

    # Sum over the medication axis M.  Row index is b*TM + m*T + t; T is a
    # multiple of 8 in this module's usage, so the split is sublane-tile
    # aligned and the reduction is cheap elementwise adds over tiles.
    embed_ref[...] = combined.reshape(Bt, M, T, E).sum(axis=1)           # (Bt, T, E)


def _choose_block_b(B, TM):
    """Pick batch rows per grid step: fill the MXU but keep >= 2 grid steps."""
    bt = max(1, pl.cdiv(256, TM))   # target ~256 MXU rows per step (v6e/v7x)
    bt = min(bt, B)
    if B >= 2:
        # Keep at least 2 "parallel" grid steps so v7x's two TensorCores are used.
        while bt > 1 and pl.cdiv(B, bt) < 2:
            bt = pl.cdiv(bt, 2)
    return bt


@jax.jit
def med_embedding_forward(medication_ids, dose, units,
                          med_table, unit_table, weight, bias):
    """medication_ids/units: (B, T, M) int, dose: (B, T, M) float."""
    B, T, M = medication_ids.shape
    Vm1, E = med_table.shape
    Vu1, Eu = unit_table.shape
    TM = M * T

    bt = _choose_block_b(B, TM)
    n_steps = pl.cdiv(B, bt)
    Bpad = n_steps * bt

    # Flatten tokens with row index m*T + t (per-m rows are a contiguous,
    # sublane-tile-aligned (T, E) slab inside the kernel).
    ids_f = jnp.transpose(medication_ids.astype(jnp.int32), (0, 2, 1)).reshape(B, TM, 1)
    units_f = jnp.transpose(units.astype(jnp.int32), (0, 2, 1)).reshape(B, TM, 1)
    dose_f = jnp.transpose(dose.astype(jnp.float32), (0, 2, 1)).reshape(B, TM, 1)

    if Bpad != B:
        pad = Bpad - B
        ids_f = jnp.pad(ids_f, ((0, pad), (0, 0), (0, 0)))
        units_f = jnp.pad(units_f, ((0, pad), (0, 0), (0, 0)))
        dose_f = jnp.pad(dose_f, ((0, pad), (0, 0), (0, 0)))

    # bf16 tables: one-hot selection stays exact; doubles MXU rate on v6e/v7x
    # and halves table residency (v7x VMEM is only 64 MiB).
    med_tab = med_table.astype(jnp.bfloat16)
    unit_tab = unit_table.astype(jnp.bfloat16)

    # Advisory cost hint for XLA's scheduler around the custom call.
    n_tok = Bpad * TM
    cost = pl.CostEstimate(
        flops=2 * n_tok * (Vm1 * E + Vu1 * Eu) + 3 * n_tok * E,
        transcendentals=0,
        bytes_accessed=(ids_f.size + units_f.size) * 4 + dose_f.size * 4
                       + (med_tab.size + unit_tab.size) * 2 + Bpad * T * E * 4,
    )

    embed_padded = pl.pallas_call(
        med_embedding_kernel,
        out_shape=jax.ShapeDtypeStruct((Bpad, T, E), jnp.float32),
        grid=(n_steps,),
        in_specs=[
            pl.BlockSpec((bt, TM, 1), lambda i: (i, 0, 0)),   # medication ids
            pl.BlockSpec((bt, TM, 1), lambda i: (i, 0, 0)),   # units
            pl.BlockSpec((bt, TM, 1), lambda i: (i, 0, 0)),   # dose
            pl.BlockSpec((Vm1, E), lambda i: (0, 0)),         # med embedding table (resident)
            pl.BlockSpec((Vu1, Eu), lambda i: (0, 0)),        # units embedding table (resident)
        ],
        out_specs=pl.BlockSpec((bt, T, E), lambda i: (i, 0, 0)),
        compiler_params=pltpu.CompilerParams(dimension_semantics=("parallel",)),
        cost_estimate=cost,
    )(ids_f, units_f, dose_f, med_tab, unit_tab)

    embed = embed_padded[:B]                                             # (B, T, E)

    # Tiny linear + sigmoid head stays in XLA (kept out of the kernel).
    pooled = jnp.sum(embed, axis=1)                                      # (B, E)
    logits = pooled @ weight.astype(jnp.float32).T + bias.astype(jnp.float32)
    pred = jax.nn.sigmoid(logits)                                        # (B, 1)
    return embed, pred


def reference_forward(medication_ids, dose, units, med_table, unit_table, weight, bias):
    u_emb = unit_table[units.astype(jnp.int32)]           # (B, T, M, Eu)
    m_emb = med_table[medication_ids.astype(jnp.int32)]   # (B, T, M, E)
    comb = (u_emb * dose[..., None].astype(jnp.float32)) * m_emb
    comb = comb.sum(axis=2)                                # (B, T, E)
    pooled = comb.sum(axis=1)                              # (B, E)
    pred = jax.nn.sigmoid(pooled @ weight.T + bias)        # (B, 1)
    return comb, pred


if __name__ == "__main__":
    # Module hyper-params (kwargs of Med_embedding.__init__)
    v_med_ids = 16
    v_units = 4
    e_dim_med_ids = 32
    e_dim_units = True            # -> units embedding dim == e_dim_med_ids
    p_idx_med_ids = 0
    p_idx_units = 0

    B, T, M = 5, 8, 4             # exercises batched blocks (Bt>1) and B padding
    E = e_dim_med_ids
    Eu = E if e_dim_units is True else 1

    key = jax.random.PRNGKey(0)
    k1, k2, k3, k4, k5, k6, k7 = jax.random.split(key, 7)

    # Deterministic parameter init (padding_idx rows zeroed, like nn.Embedding).
    # Tables are snapped to bf16-representable values so the f32 reference
    # matches the kernel's bf16 MXU gather path at tight tolerance.
    med_table = jax.random.normal(k1, (v_med_ids + 1, E), dtype=jnp.float32)
    med_table = med_table.astype(jnp.bfloat16).astype(jnp.float32)
    med_table = med_table.at[p_idx_med_ids].set(0.0)
    unit_table = jax.random.normal(k2, (v_units + 1, Eu), dtype=jnp.float32)
    unit_table = unit_table.astype(jnp.bfloat16).astype(jnp.float32)
    unit_table = unit_table.at[p_idx_units].set(0.0)
    weight = jax.random.normal(k3, (1, E), dtype=jnp.float32) * 0.1
    bias = jax.random.normal(k4, (1,), dtype=jnp.float32) * 0.1

    # Inputs
    medication_ids = jax.random.randint(k5, (B, T, M), 0, v_med_ids + 1, dtype=jnp.int32)
    units = jax.random.randint(k6, (B, T, M), 0, v_units + 1, dtype=jnp.int32)
    dose = jax.random.uniform(k7, (B, T, M), dtype=jnp.float32)

    embed, pred = med_embedding_forward(
        medication_ids, dose, units, med_table, unit_table, weight, bias)
    jax.block_until_ready((embed, pred))

    embed_ref, pred_ref = reference_forward(
        medication_ids, dose, units, med_table, unit_table, weight, bias)

    assert embed.shape == (B, T, E) and pred.shape == (B, 1)
    assert jnp.allclose(embed, embed_ref, atol=1e-4, rtol=1e-4)
    assert jnp.allclose(pred, pred_ref, atol=1e-5, rtol=1e-5)

    print("KERNEL_OK")
</pallas_src>

<mosaic_0001>
module attributes {stable_mosaic.version = 11 : i64} {
  func.func @med_embedding_kernel(%arg0: i32, %arg1: memref<3x32x1xi32, #tpu.memory_space<vmem>>, %arg2: memref<3x32x1xi32, #tpu.memory_space<vmem>>, %arg3: memref<3x32x1xf32, #tpu.memory_space<vmem>>, %arg4: memref<17x32xbf16, #tpu.memory_space<vmem>>, %arg5: memref<5x32xbf16, #tpu.memory_space<vmem>>, %arg6: memref<3x8x32xf32, #tpu.memory_space<vmem>>) attributes {dimension_semantics = [#tpu.dimension_semantics<parallel>], iteration_bounds = array<i64: 2>, scalar_prefetch = 0 : i64, scratch_operands = 0 : i64, tpu.core_type = #tpu.core_type<tc>, window_params = [{transform_indices = @transform_0, window_bounds = array<i64: 3, 32, 1>}, {transform_indices = @transform_1, window_bounds = array<i64: 3, 32, 1>}, {transform_indices = @transform_2, window_bounds = array<i64: 3, 32, 1>}, {pipeline_mode = #tpu.pipeline_mode<synchronous>, transform_indices = @transform_3, window_bounds = array<i64: 17, 32>}, {pipeline_mode = #tpu.pipeline_mode<synchronous>, transform_indices = @transform_4, window_bounds = array<i64: 5, 32>}, {transform_indices = @transform_5, window_bounds = array<i64: 3, 8, 32>}]} {
    %c0 = arith.constant 0 : index
    %c0_0 = arith.constant 0 : index
    %c0_1 = arith.constant 0 : index
    %0 = vector.load %arg1[%c0, %c0_0, %c0_1] : memref<3x32x1xi32, #tpu.memory_space<vmem>>, vector<3x32x1xi32>
    %1 = vector.shape_cast %0 : vector<3x32x1xi32> to vector<96x1xi32>
    %c0_2 = arith.constant 0 : index
    %c0_3 = arith.constant 0 : index
    %c0_4 = arith.constant 0 : index
    %2 = vector.load %arg2[%c0_2, %c0_3, %c0_4] : memref<3x32x1xi32, #tpu.memory_space<vmem>>, vector<3x32x1xi32>
    %3 = vector.shape_cast %2 : vector<3x32x1xi32> to vector<96x1xi32>
    %c0_5 = arith.constant 0 : index
    %c0_6 = arith.constant 0 : index
    %c0_7 = arith.constant 0 : index
    %4 = vector.load %arg3[%c0_5, %c0_6, %c0_7] : memref<3x32x1xf32, #tpu.memory_space<vmem>>, vector<3x32x1xf32>
    %5 = vector.shape_cast %4 : vector<3x32x1xf32> to vector<96x1xf32>
    %6 = tpu.iota {dimensions = array<i32: 1>} : vector<96x17xi32>
    %7 = vector.broadcast %1 : vector<96x1xi32> to vector<96x17xi32>
    %8 = arith.cmpi eq, %7, %6 : vector<96x17xi32>
    %9 = arith.extui %8 : vector<96x17xi1> to vector<96x17xi32>
    %10 = arith.sitofp %9 : vector<96x17xi32> to vector<96x17xf32>
    %11 = arith.truncf %10 : vector<96x17xf32> to vector<96x17xbf16>
    %c0_8 = arith.constant 0 : index
    %c0_9 = arith.constant 0 : index
    %12 = vector.load %arg4[%c0_8, %c0_9] : memref<17x32xbf16, #tpu.memory_space<vmem>>, vector<17x32xbf16>
    %cst = arith.constant dense<0.000000e+00> : vector<96x32xf32>
    %13 = tpu.matmul %11, %12, %cst {dimension_numbers = #tpu.dot_dimension_numbers<[1], [0], [0], [1], [0, 0, 1, 1], [], []>} : vector<96x17xbf16>, vector<17x32xbf16>, vector<96x32xf32> -> vector<96x32xf32>
    %14 = tpu.iota {dimensions = array<i32: 1>} : vector<96x5xi32>
    %15 = vector.broadcast %3 : vector<96x1xi32> to vector<96x5xi32>
    %16 = arith.cmpi eq, %15, %14 : vector<96x5xi32>
    %17 = arith.extui %16 : vector<96x5xi1> to vector<96x5xi32>
    %18 = arith.sitofp %17 : vector<96x5xi32> to vector<96x5xf32>
    %19 = arith.truncf %18 : vector<96x5xf32> to vector<96x5xbf16>
    %c0_10 = arith.constant 0 : index
    %c0_11 = arith.constant 0 : index
    %20 = vector.load %arg5[%c0_10, %c0_11] : memref<5x32xbf16, #tpu.memory_space<vmem>>, vector<5x32xbf16>
    %cst_12 = arith.constant dense<0.000000e+00> : vector<96x32xf32>
    %21 = tpu.matmul %19, %20, %cst_12 {dimension_numbers = #tpu.dot_dimension_numbers<[1], [0], [0], [1], [0, 0, 1, 1], [], []>} : vector<96x5xbf16>, vector<5x32xbf16>, vector<96x32xf32> -> vector<96x32xf32>
    %22 = vector.broadcast %5 : vector<96x1xf32> to vector<96x32xf32>
    %23 = arith.mulf %21, %22 : vector<96x32xf32>
    %24 = arith.mulf %23, %13 : vector<96x32xf32>
    %25 = vector.shape_cast %24 : vector<96x32xf32> to vector<3x4x8x32xf32>
    %cst_13 = arith.constant dense<0.000000e+00> : vector<3x8x32xf32>
    %26 = vector.multi_reduction <add>, %25, %cst_13 [1] : vector<3x4x8x32xf32> to vector<3x8x32xf32>
    %c0_14 = arith.constant 0 : index
    %c0_15 = arith.constant 0 : index
    %c0_16 = arith.constant 0 : index
    %27 = vector.load %arg6[%c0_14, %c0_15, %c0_16] : memref<3x8x32xf32, #tpu.memory_space<vmem>>, vector<3x8x32xf32>
    tpu.vector_store %arg6[%c0_14, %c0_15, %c0_16], %26 {strides = array<i32>} : memref<3x8x32xf32, #tpu.memory_space<vmem>>, vector<3x8x32xf32>,
    return
  }
  func.func @transform_0(%arg0: i32) -> (i32, i32, i32) {
    %c0_i32 = arith.constant 0 : i32
    %c0_i32_0 = arith.constant 0 : i32
    %c0_i32_1 = arith.constant 0 : i32
    return %arg0, %c0_i32, %c0_i32_0 : i32, i32, i32
  }
  func.func @transform_1(%arg0: i32) -> (i32, i32, i32) {
    %c0_i32 = arith.constant 0 : i32
    %c0_i32_0 = arith.constant 0 : i32
    %c0_i32_1 = arith.constant 0 : i32
    return %arg0, %c0_i32, %c0_i32_0 : i32, i32, i32
  }
  func.func @transform_2(%arg0: i32) -> (i32, i32, i32) {
    %c0_i32 = arith.constant 0 : i32
    %c0_i32_0 = arith.constant 0 : i32
    %c0_i32_1 = arith.constant 0 : i32
    return %arg0, %c0_i32, %c0_i32_0 : i32, i32, i32
  }
  func.func @transform_3(%arg0: i32) -> (i32, i32) {
    %c0_i32 = arith.constant 0 : i32
    %c0_i32_0 = arith.constant 0 : i32
    %c0_i32_1 = arith.constant 0 : i32
    return %c0_i32, %c0_i32_0 : i32, i32
  }
  func.func @transform_4(%arg0: i32) -> (i32, i32) {
    %c0_i32 = arith.constant 0 : i32
    %c0_i32_0 = arith.constant 0 : i32
    %c0_i32_1 = arith.constant 0 : i32
    return %c0_i32, %c0_i32_0 : i32, i32
  }
  func.func @transform_5(%arg0: i32) -> (i32, i32, i32) {
    %c0_i32 = arith.constant 0 : i32
    %c0_i32_0 = arith.constant 0 : i32
    %c0_i32_1 = arith.constant 0 : i32
    return %arg0, %c0_i32, %c0_i32_0 : i32, i32, i32
  }
}

</mosaic_0001>

<bundles_post_ra>
// kernel: med_embedding_forward.1
= control target key start
LH: loop header
LB: loop body
LE: loop exit
PB: predicated region body
PF: predicated region fallthrough
CT: control target
= control target key end

     0   :  { %s1047_s18 = smov 0   ;;  %s1204_s0 = inlined_call_operand.vmem [shape: s32[6,32,1], index: 0, kind: input, shape index: {}]   ;;  %s1205_s1 = inlined_call_operand.vmem [shape: s32[6,32,1], index: 1, kind: input, shape index: {}]   ;;  %s1206_s2 = inlined_call_operand.vmem [shape: f32[6,32,1], index: 2, kind: input, shape index: {}]   ;;  %s1207_s3 = inlined_call_operand.vmem [shape: bf16[17,32], index: 3, kind: input, shape index: {}]   ;;  %s1208_s4 = inlined_call_operand.vmem [shape: bf16[5,32], index: 4, kind: input, shape index: {}]   ;;  %s1209_s5 = inlined_call_operand.vmem [shape: f32[6,8,32], index: 5, kind: output, shape index: {}]  }
   0x1 LB: > { %s891_s19 = sadd.s32 4294967295, %s1012_s18   ;;  %p895_p0 = scmp.ge.s32.totalorder %s1012_s18, 1  ;;  %s1012_s18 = sphi %s1047_s18, %s15_s18  }
   0x2   : > { %p213_p1 = scmp.lt.s32.totalorder %s1012_s18, 3 }
   0x4   : > { %p214_p2 = pnand %p895_p0, %p213_p1 }
   0x5   : > { %s254_s20 = smul.u32 (!%p214_p2), 3, %s891_s19  ;;  %v1014_v0 = vmov (!%p214_p2), 0   ;;  %vm614_vm0 = vcmask (!%p214_p2), 1041408   ;;  %vm615_vm1 = vcmask (!%p214_p2), 1042432   ;;  %v1015_v7 = vmov (!%p214_p2), 65535   ;;  %v1004_v14 = vld [vmem:[%s1207_s3] sm:$0xff] (!%p214_p2)  }
   0x6   : > { %217 = sbr.rel (%p214_p2) target bundleno = 418 (0x1a2), region = 40  ;;  %1003 = vset.pattern.permute.xlu1 (!%p214_p2), %v1014_v0  ;;  %1002 = vset.pattern.permute.xlu0 (!%p214_p2), %v1014_v0  ;;  %v616_v8 = vsel (!%p214_p2), %vm614_vm0, 4294967295, %v1015_v7  ;;  %vm429_vm2 = vcmask (!%p214_p2), 1040384   ;;  %v594_v13 = vld [vmem:[%s1208_s4] sm:$0x7] (!%p214_p2)  ;;  %v318_v46 = vlaneseq (!%p214_p2)  ;;  %vm595_vm7 = vcmask (!%p214_p2), 39936  }
   0x7   : > { %p255_p3 = scmp.lt.s32.totalorder (!%p214_p2), %s254_s20, 5  ;;  %v617_v11 = vsel (!%p214_p2), %vm615_vm1, %v616_v8, 0  ;;  %v431_v12 = vsel (!%p214_p2), %vm429_vm2, 65535, %v1014_v0  ;;  %v1005_v15 = vld [vmem:[%s1207_s3 + $0x8] ss:$0 sps:$4 sm:$0x11] (!%p214_p2)   ;;  %961 = vmatprep.subr.bf16.mxu0 (!%p214_p2), %v1004_v14 }
   0x8   : > { %v619_v16 = vand.u32 (!%p214_p2), %v617_v11, %v594_v13  ;;  %v433_v19 = vand.u32 (!%p214_p2), %v1005_v15, %v431_v12  ;;  %962 = vmatpush3.bf16.msra.mxu0 (!%p214_p2), %v1004_v14  ;;  %v1109_v47 = vand.u32 (!%p214_p2), 127, %v318_v46  ;;  %v1016_v52 = vmov (!%p214_p2), 0.0  }
   0x9   : > { %vm410_vm10 = vcmask (!%p214_p2), 138240  }
   0xa   : > { %977 = vmatprep.subr.bf16.mxu1 (!%p214_p2), %v619_v16  ;;  %963 = vmatprep.subr.bf16.mxu0 (!%p214_p2), %v433_v19 }
   0xb   : > { %978 = vmatpush3.bf16.msra.mxu1 (!%p214_p2), %v619_v16 }
   0xc   : > { %964 = vmatpush3.bf16.msra.mxu0 (!%p214_p2), %v433_v19 }
   0xd   : > { %s1211_s20 = smov (!%p255_p3, %s254_s20), 5 }
   0xe   : > { %s1058_s21 = sshll.u32 %s1211_s20, 5  ;;  %s902_s12 = sshll.u32 %s1211_s20, 3 }
   0xf   : > { %s1064_s24 = scalar_lea.vmem %s1205_s1, %s1058_s21  ;;  %s1074_s27 = scalar_lea.vmem %s1204_s0, %s1058_s21 }
  0x10   : > { %v296_v1 = vld [vmem:[%s1064_s24 + $0x10] sm:$0xff]  ;;  %v294_v2 = vld [vmem:[%s1064_s24] sm:$0xff]  ;;  %v297_v3 = vld [vmem:[%s1064_s24 + $0x18] sm:$0xff]  ;;  %s273_s11 = scalar_lea.vmem %s1206_s2, %s1058_s21  ;;  %s1183_s15 = scalar_lea.vmem %s1209_s5, %s902_s12 }
  0x11   : > { %523 = vperm.xlu1 %1003, %v296_v1   ;;  %517 = vperm.xlu0 %1002, %v294_v2   ;;  %v295_v4 = vld [vmem:[%s1064_s24 + $0x8] sm:$0xff]  ;;  %v282_v6 = vld [vmem:[%s1074_s27] sm:$0xff]  ;;  %v285_v9 = vld [vmem:[%s1074_s27 + $0x18] sm:$0xff] }
  0x12   : > { %v283_v5 = vld [vmem:[%s1074_s27 + $0x8] sm:$0xff]  ;;  %v284_v10 = vld [vmem:[%s1074_s27 + $0x10] sm:$0xff]  ;;  %v298_v18 = vld [vmem:[%s1064_s24 + $0x20] sm:$0xff] }
  0x13   : > { %v299_v17 = vld [vmem:[%s1064_s24 + $0x28] sm:$0xff]  ;;  %v301_v20 = vld [vmem:[%s1064_s24 + $0x38] sm:$0xff]  ;;  %v300_v21 = vld [vmem:[%s1064_s24 + $0x30] sm:$0xff] }
  0x14   : > { %v287_v22 = vld [vmem:[%s1074_s27 + $0x28] sm:$0xff]  ;;  %v286_v23 = vld [vmem:[%s1074_s27 + $0x20] sm:$0xff]  ;;  %v289_v24 = vld [vmem:[%s1074_s27 + $0x38] sm:$0xff] }
  0x15   : > { %526 = vperm.xlu1 %1003, %v297_v3   ;;  %520 = vperm.xlu0 %1002, %v295_v4   ;;  %v288_v25 = vld [vmem:[%s1074_s27 + $0x30] sm:$0xff]  ;;  %v303_v26 = vld [vmem:[%s1064_s24 + $0x48] sm:$0xff]  ;;  %v302_v27 = vld [vmem:[%s1064_s24 + $0x40] sm:$0xff] }
  0x16   : > { %v305_v28 = vld [vmem:[%s1064_s24 + $0x58] sm:$0xff]  ;;  %v304_v29 = vld [vmem:[%s1064_s24 + $0x50] sm:$0xff]  ;;  %v291_v30 = vld [vmem:[%s1074_s27 + $0x48] sm:$0xff] }
  0x17   : > { %v290_v31 = vld [vmem:[%s1074_s27 + $0x40] sm:$0xff]  ;;  %v293_v32 = vld [vmem:[%s1074_s27 + $0x58] sm:$0xff]  ;;  %v292_v33 = vld [vmem:[%s1074_s27 + $0x50] sm:$0xff] }
  0x18   : > { %v307_v34 = vld [vmem:[%s273_s11 + $0x8] sm:$0xff]  ;;  %v306_v35 = vld [vmem:[%s273_s11] sm:$0xff]  ;;  %v312_v40 = vld [vmem:[%s273_s11 + $0x30] sm:$0xff] }
  0x19   : > { %324 = vperm.xlu1 %1003, %v283_v5   ;;  %321 = vperm.xlu0 %1002, %v282_v6   ;;  %v311_v36 = vld [vmem:[%s273_s11 + $0x28] sm:$0xff]  ;;  %v310_v37 = vld [vmem:[%s273_s11 + $0x20] sm:$0xff]  ;;  %v308_v41 = vld [vmem:[%s273_s11 + $0x10] sm:$0xff] }
  0x1a   : > { %v315_v38 = vld [vmem:[%s273_s11 + $0x48] sm:$0xff]  ;;  %v314_v39 = vld [vmem:[%s273_s11 + $0x40] sm:$0xff]  ;;  %v309_v42 = vld [vmem:[%s273_s11 + $0x18] sm:$0xff] }
  0x1b   : > { %v316_v43 = vld [vmem:[%s273_s11 + $0x50] sm:$0xff]  ;;  %v317_v44 = vld [vmem:[%s273_s11 + $0x58] sm:$0xff] }
  0x1c   : > { %v313_v45 = vld [vmem:[%s273_s11 + $0x38] sm:$0xff] }
  0x1d   : > { %330 = vperm.xlu1 %1003, %v285_v9   ;;  %327 = vperm.xlu0 %1002, %v284_v10  }
  0x21   : > { %532 = vperm.xlu1 %1003, %v299_v17   ;;  %529 = vperm.xlu0 %1002, %v298_v18  }
  0x25   : > { %538 = vperm.xlu1 %1003, %v301_v20   ;;  %535 = vperm.xlu0 %1002, %v300_v21  }
  0x29   : > { %336 = vperm.xlu1 %1003, %v287_v22   ;;  %333 = vperm.xlu0 %1002, %v286_v23  }
  0x2d   : > { %342 = vperm.xlu1 %1003, %v289_v24   ;;  %339 = vperm.xlu0 %1002, %v288_v25  }
  0x31   : > { %544 = vperm.xlu1 %1003, %v303_v26   ;;  %541 = vperm.xlu0 %1002, %v302_v27  }
  0x35   : > { %550 = vperm.xlu1 %1003, %v305_v28   ;;  %547 = vperm.xlu0 %1002, %v304_v29  }
  0x39   : > { %348 = vperm.xlu1 %1003, %v291_v30   ;;  %345 = vperm.xlu0 %1002, %v290_v31  }
  0x3d   : > { %354 = vperm.xlu1 %1003, %v293_v32   ;;  %351 = vperm.xlu0 %1002, %v292_v33  }
  0x41   : > { %709 = vperm.xlu1 %1003, %v307_v34   ;;  %704 = vperm.xlu0 %1002, %v306_v35  }
  0x45   : > { %729 = vperm.xlu1 %1003, %v311_v36   ;;  %724 = vperm.xlu0 %1002, %v310_v37  }
  0x49   : > { %749 = vperm.xlu1 %1003, %v315_v38   ;;  %744 = vperm.xlu0 %1002, %v314_v39  }
  0x4d   : > { %734 = vperm.xlu1 %1003, %v312_v40   ;;  %714 = vperm.xlu0 %1002, %v308_v41  }
  0x51   : > { %719 = vperm.xlu1 %1003, %v309_v42   ;;  %754 = vperm.xlu0 %1002, %v316_v43  }
  0x55   : > { %759 = vperm.xlu1 %1003, %v317_v44   ;;  %739 = vperm.xlu0 %1002, %v313_v45  }
  0x90   : > { %v524_v48 = vpop.permute.xlu1 %523  ;;  %v518_v49 = vpop.permute.xlu0 %517 }
  0x91   : > { %vm554_vm3 = vcmp.eq.s32.totalorder %v524_v48, %v1109_v47  ;;  %vm552_vm4 = vcmp.eq.s32.totalorder %v518_v49, %v1109_v47 }
  0x92   : > { %v925_v53 = vsel %vm554_vm3, 1.0, %v1016_v52  ;;  %v923_v54 = vsel %vm552_vm4, 1.0, %v1016_v52 }
  0x94   : > { %v527_v50 = vpop.permute.xlu1 %526  ;;  %v521_v51 = vpop.permute.xlu0 %520 }
  0x95   : > { %vm555_vm5 = vcmp.eq.s32.totalorder %v527_v50, %v1109_v47  ;;  %vm553_vm6 = vcmp.eq.s32.totalorder %v521_v51, %v1109_v47 }
  0x96   : > { %v926_v55 = vsel %vm555_vm5, 1.0, %v1016_v52  ;;  %v924_v56 = vsel %vm553_vm6, 1.0, %v1016_v52 }
  0x97   : > { %v589_v57 = vpack.c.bf16 %v926_v55, %v925_v53  ;;  %v588_v58 = vpack.c.bf16 %v924_v56, %v923_v54 }
  0x98   : > { %v325_v59 = vpop.permute.xlu1 %324  ;;  %v322_v60 = vpop.permute.xlu0 %321 }
  0x99   : > { %vm357_vm8 = vcmp.eq.s32.totalorder %v325_v59, %v1109_v47  ;;  %vm356_vm9 = vcmp.eq.s32.totalorder %v322_v60, %v1109_v47  ;;  %979 = vmatprep.mubr.msk.bf16.mxu1 %vm595_vm7, %v588_v58 }
  0x9a   : > { %v904_v61 = vsel %vm357_vm8, 1.0, %v1016_v52  ;;  %v903_v62 = vsel %vm356_vm9, 1.0, %v1016_v52  ;;  %980 = vmatmul.mubr.msk.bf16.vlgmr.msra.gmra.mrb[0].mxu1 %vm595_vm7, %v589_v57 }
  0x9b   : > { %v392_v63 = vpack.c.bf16 %v904_v61, %v903_v62 }
  0x9c   : > { %v331_v0 = vpop.permute.xlu1 %330  ;;  %v328_v1 = vpop.permute.xlu0 %327 }
  0x9d   : > { %vm359_vm11 = vcmp.eq.s32.totalorder %v331_v0, %v1109_v47  ;;  %vm358_vm12 = vcmp.eq.s32.totalorder %v328_v1, %v1109_v47  ;;  %965 = vmatprep.mubr.msk.bf16.mxu0 %vm410_vm10, %v392_v63 }
  0x9e   : > { %v906_v2 = vsel %vm359_vm11, 1.0, %v1016_v52  ;;  %v905_v3 = vsel %vm358_vm12, 1.0, %v1016_v52 }
  0x9f   : > { %v393_v4 = vpack.c.bf16 %v906_v2, %v905_v3 }
  0xa0   : > { %v533_v5 = vpop.permute.xlu1 %532  ;;  %v530_v6 = vpop.permute.xlu0 %529 }
  0xa1   : > { %vm557_vm13 = vcmp.eq.s32.totalorder %v533_v5, %v1109_v47  ;;  %vm556_vm14 = vcmp.eq.s32.totalorder %v530_v6, %v1109_v47  ;;  %966 = vmatmul.mubr.msk.bf16.vlgmr.msra.gmra.mrb[0].mxu0 %vm410_vm10, %v393_v4 }
  0xa2   : > { %v928_v7 = vsel %vm557_vm13, 1.0, %v1016_v52  ;;  %v927_v8 = vsel %vm556_vm14, 1.0, %v1016_v52 }
  0xa3   : > { %v590_v9 = vpack.c.bf16 %v928_v7, %v927_v8 }
  0xa4   : > { %v539_v10 = vpop.permute.xlu1 %538  ;;  %v536_v11 = vpop.permute.xlu0 %535 }
  0xa5   : > { %vm559_vm15 = vcmp.eq.s32.totalorder %v539_v10, %v1109_v47  ;;  %vm558_vm0 = vcmp.eq.s32.totalorder %v536_v11, %v1109_v47  ;;  %983 = vmatprep.mubr.msk.bf16.mxu1 %vm595_vm7, %v590_v9 }
  0xa6   : > { %v930_v12 = vsel %vm559_vm15, 1.0, %v1016_v52  ;;  %v929_v13 = vsel %vm558_vm0, 1.0, %v1016_v52 }
  0xa7   : > { %v591_v14 = vpack.c.bf16 %v930_v12, %v929_v13 }
  0xa8   : > { %v337_v15 = vpop.permute.xlu1 %336  ;;  %v334_v16 = vpop.permute.xlu0 %333 }
  0xa9   : > { %vm361_vm1 = vcmp.eq.s32.totalorder %v337_v15, %v1109_v47  ;;  %vm360_vm2 = vcmp.eq.s32.totalorder %v334_v16, %v1109_v47  ;;  %984 = vmatmul.mubr.msk.bf16.gmra.mrb[4].mxu1 %vm595_vm7, %v591_v14 }
  0xaa   : > { %v908_v17 = vsel %vm361_vm1, 1.0, %v1016_v52  ;;  %v907_v18 = vsel %vm360_vm2, 1.0, %v1016_v52 }
  0xab   : > { %v394_v19 = vpack.c.bf16 %v908_v17, %v907_v18 }
  0xac   : > { %v343_v20 = vpop.permute.xlu1 %342  ;;  %v340_v21 = vpop.permute.xlu0 %339 }
  0xad   : > { %vm363_vm3 = vcmp.eq.s32.totalorder %v343_v20, %v1109_v47  ;;  %vm362_vm4 = vcmp.eq.s32.totalorder %v340_v21, %v1109_v47  ;;  %969 = vmatprep.mubr.msk.bf16.mxu0 %vm410_vm10, %v394_v19 }
  0xae   : > { %v910_v22 = vsel %vm363_vm3, 1.0, %v1016_v52  ;;  %v909_v23 = vsel %vm362_vm4, 1.0, %v1016_v52 }
  0xaf   : > { %v395_v24 = vpack.c.bf16 %v910_v22, %v909_v23 }
  0xb0   : > { %v545_v25 = vpop.permute.xlu1 %544  ;;  %v542_v26 = vpop.permute.xlu0 %541 }
  0xb1   : > { %vm561_vm5 = vcmp.eq.s32.totalorder %v545_v25, %v1109_v47  ;;  %vm560_vm6 = vcmp.eq.s32.totalorder %v542_v26, %v1109_v47  ;;  %970 = vmatmul.mubr.msk.bf16.gmra.mrb[4].mxu0 %vm410_vm10, %v395_v24 }
  0xb2   : > { %v932_v27 = vsel %vm561_vm5, 1.0, %v1016_v52  ;;  %v931_v28 = vsel %vm560_vm6, 1.0, %v1016_v52 }
  0xb3   : > { %v592_v29 = vpack.c.bf16 %v932_v27, %v931_v28 }
  0xb4   : > { %v551_v30 = vpop.permute.xlu1 %550  ;;  %v548_v31 = vpop.permute.xlu0 %547 }
  0xb5   : > { %vm563_vm8 = vcmp.eq.s32.totalorder %v551_v30, %v1109_v47  ;;  %vm562_vm9 = vcmp.eq.s32.totalorder %v548_v31, %v1109_v47  ;;  %987 = vmatprep.mubr.msk.bf16.mxu1 %vm595_vm7, %v592_v29 }
  0xb6   : > { %v934_v32 = vsel %vm563_vm8, 1.0, %v1016_v52  ;;  %v933_v33 = vsel %vm562_vm9, 1.0, %v1016_v52 }
  0xb7   : > { %v593_v34 = vpack.c.bf16 %v934_v32, %v933_v33 }
  0xb8   : > { %v349_v35 = vpop.permute.xlu1 %348  ;;  %v346_v36 = vpop.permute.xlu0 %345 }
  0xb9   : > { %vm365_vm11 = vcmp.eq.s32.totalorder %v349_v35, %v1109_v47  ;;  %vm364_vm12 = vcmp.eq.s32.totalorder %v346_v36, %v1109_v47  ;;  %988 = vmatmul.mubr.msk.bf16.gmra.mrb[8].mxu1 %vm595_vm7, %v593_v34  ;;  %vm786_vm7 = vcmask 261120  }
  0xba   : > { %v912_v37 = vsel %vm365_vm11, 1.0, %v1016_v52  ;;  %v911_v38 = vsel %vm364_vm12, 1.0, %v1016_v52 }
  0xbb   : > { %v396_v39 = vpack.c.bf16 %v912_v37, %v911_v38 }
  0xbc   : > { %v355_v40 = vpop.permute.xlu1 %354  ;;  %v352_v41 = vpop.permute.xlu0 %351 }
  0xbd   : > { %vm367_vm13 = vcmp.eq.s32.totalorder %v355_v40, %v1109_v47  ;;  %vm366_vm14 = vcmp.eq.s32.totalorder %v352_v41, %v1109_v47  ;;  %973 = vmatprep.mubr.msk.bf16.mxu0 %vm410_vm10, %v396_v39 }
  0xbe   : > { %v914_v42 = vsel %vm367_vm13, 1.0, %v1016_v52  ;;  %v913_v43 = vsel %vm366_vm14, 1.0, %v1016_v52 }
  0xbf   : > { %v397_v44 = vpack.c.bf16 %v914_v42, %v913_v43 }
  0xc0   : > { %v710_v45 = vpop.permute.xlu1 %709  ;;  %v705_v46 = vpop.permute.xlu0 %704 }
  0xc1   : > { %974 = vmatmul.mubr.msk.bf16.gmra.mrb[8].mxu0 %vm410_vm10, %v397_v44 }
  0xc4   : > { %v730_v48 = vpop.permute.xlu1 %729  ;;  %v725_v49 = vpop.permute.xlu0 %724 }
  0xc8   : > { %v1171_v50 = vpop.permute.xlu1 %749  ;;  %v1173_v51 = vpop.permute.xlu0 %744 }
  0xcc   : > { %v735_v54 = vpop.permute.xlu1 %734  ;;  %v715_v57 = vpop.permute.xlu0 %714 }
  0xd0   : > { %v720_v52 = vpop.permute.xlu1 %719  ;;  %v755_v13 = vpop.permute.xlu0 %754 }
  0xd4   : > { %v740_v19 = vpop.permute.xlu0 %739  ;;  %v760_v43 = vpop.permute.xlu1 %759 }
 0x16d   : > { %v981_v53 = vpop.f32.mrb[0].mxu1 }
 0x16e   : > { %v655_v47 = vpop.f32.mrb[1].mxu1  ;;  %v764_v58 = vmul.f32 %v981_v53, %v715_v57 }
 0x16f   : > { %v982_v55 = vpop.f32.mrb[2].mxu1  ;;  %v762_v59 = vmul.f32 %v705_v46, %v655_v47 }
 0x170   : > { %v658_v56 = vpop.f32.mrb[3].mxu1  ;;  %v765_v61 = vmul.f32 %v982_v55, %v720_v52 }
 0x171   : > { %v763_v0 = vmul.f32 %v710_v45, %v658_v56 }
 0x174   : > { %v967_v60 = vpop.f32.mrb[0].mxu0 }
 0x175   : > { %v776_v62 = vmul.f32 %v967_v60, %v764_v58  ;;  %v469_v63 = vpop.f32.mrb[1].mxu0 }
 0x176   : > { %v774_v1 = vmul.f32 %v762_v59, %v469_v63  ;;  %v968_v2 = vpop.f32.mrb[2].mxu0 }
 0x177   : > { %v777_v3 = vmul.f32 %v968_v2, %v765_v61  ;;  %v472_v4 = vpop.f32.mrb[3].mxu0  ;;  %v790_v9 = vsel %vm786_vm7, %v776_v62, 0.0 }
 0x178   : > { %v775_v5 = vmul.f32 %v763_v0, %v472_v4  ;;  %v787_v6 = vsel %vm786_vm7, %v774_v1, 0.0 }
 0x179   : > { %v792_v14 = vsel %vm786_vm7, %v777_v3, 0.0 }
 0x17a   : > { %v788_v7 = vsel %vm786_vm7, %v775_v5, 0.0 }
 0x17b   : > { %v789_v8 = vadd.f32 %v788_v7, %v787_v6 }
 0x17c   : > { %v985_v10 = vpop.f32.mrb[4].mxu1 }
 0x17d   : > { %v791_v11 = vadd.f32 %v790_v9, %v789_v8  ;;  %v671_v12 = vpop.f32.mrb[5].mxu1  ;;  %v768_v18 = vmul.f32 %v985_v10, %v735_v54 }
 0x17e   : > { %v986_v15 = vpop.f32.mrb[6].mxu1  ;;  %v766_v20 = vmul.f32 %v725_v49, %v671_v12 }
 0x17f   : > { %v793_v16 = vadd.f32 %v792_v14, %v791_v11  ;;  %v674_v17 = vpop.f32.mrb[7].mxu1  ;;  %v769_v22 = vmul.f32 %v986_v15, %v740_v19 }
 0x180   : > { %v767_v25 = vmul.f32 %v730_v48, %v674_v17 }
 0x181   : > { %808 = vst.msk [vmem:[%s1183_s15] sm:$0xff] %vm786_vm7, %v793_v16 }
 0x184   : > { %v971_v21 = vpop.f32.mrb[4].mxu0 }
 0x185   : > { %v780_v23 = vmul.f32 %v971_v21, %v768_v18  ;;  %v485_v24 = vpop.f32.mrb[5].mxu0 }
 0x186   : > { %v778_v26 = vmul.f32 %v766_v20, %v485_v24  ;;  %v972_v27 = vpop.f32.mrb[6].mxu0 }
 0x187   : > { %v781_v28 = vmul.f32 %v972_v27, %v769_v22  ;;  %v488_v29 = vpop.f32.mrb[7].mxu0  ;;  %v797_v34 = vsel %vm786_vm7, %v780_v23, 0.0 }
 0x188   : > { %v779_v30 = vmul.f32 %v767_v25, %v488_v29  ;;  %v794_v31 = vsel %vm786_vm7, %v778_v26, 0.0 }
 0x189   : > { %v799_v38 = vsel %vm786_vm7, %v781_v28, 0.0 }
 0x18a   : > { %v795_v32 = vsel %vm786_vm7, %v779_v30, 0.0 }
 0x18b   : > { %v796_v33 = vadd.f32 %v795_v32, %v794_v31 }
 0x18c   : > { %v989_v35 = vpop.f32.mrb[8].mxu1 }
 0x18d   : > { %v798_v36 = vadd.f32 %v797_v34, %v796_v33  ;;  %v687_v37 = vpop.f32.mrb[9].mxu1  ;;  %v772_v42 = vmul.f32 %v989_v35, %v755_v13 }
 0x18e   : > { %v990_v39 = vpop.f32.mrb[10].mxu1  ;;  %v770_v44 = vmul.f32 %v1173_v51, %v687_v37 }
 0x18f   : > { %v800_v40 = vadd.f32 %v799_v38, %v798_v36  ;;  %v690_v41 = vpop.f32.mrb[11].mxu1  ;;  %v773_v46 = vmul.f32 %v990_v39, %v760_v43 }
 0x190   : > { %v771_v53 = vmul.f32 %v1171_v50, %v690_v41 }
 0x191   : > { %809 = vst.msk [vmem:[%s1183_s15 + $0x8] sm:$0xff] %vm786_vm7, %v800_v40 }
 0x194   : > { %v975_v45 = vpop.f32.mrb[8].mxu0 }
 0x195   : > { %v784_v48 = vmul.f32 %v975_v45, %v772_v42  ;;  %v501_v49 = vpop.f32.mrb[9].mxu0 }
 0x196   : > { %v782_v54 = vmul.f32 %v770_v44, %v501_v49  ;;  %v976_v47 = vpop.f32.mrb[10].mxu0 }
 0x197   : > { %v785_v55 = vmul.f32 %v976_v47, %v773_v46  ;;  %v504_v56 = vpop.f32.mrb[11].mxu0  ;;  %v804_v60 = vsel %vm786_vm7, %v784_v48, 0.0 }
 0x198   : > { %v783_v57 = vmul.f32 %v771_v53, %v504_v56  ;;  %v801_v58 = vsel %vm786_vm7, %v782_v54, 0.0 }
 0x199   : > { %v806_v61 = vsel %vm786_vm7, %v785_v55, 0.0 }
 0x19a   : > { %v802_v52 = vsel %vm786_vm7, %v783_v57, 0.0 }
 0x19b   : > { %v803_v59 = vadd.f32 %v802_v52, %v801_v58 }
 0x19d   : > { %v805_v51 = vadd.f32 %v804_v60, %v803_v59 }
 0x19f   : > { %v807_v62 = vadd.f32 %v806_v61, %v805_v51 }
 0x1a1   : > { %810 = vst.msk [vmem:[%s1183_s15 + $0x10] sm:$0xff] %vm786_vm7, %v807_v62 }
 0x1a2 PF: > { %s15_s18 = sadd.s32 1, %s1012_s18  }
 0x1a3   : > { %p12_p4 = scmp.ge.s32.totalorder %s15_s18, 4  }
 0x1a5   :  { %14 = sbr.rel (!%p12_p4) target bundleno = 1 (0x1), region = 76 }

</bundles_post_ra>
